<compile_context>
chip_gen: v6e
topology: v6e:2x2x1
jax: 0.10.0
libtpu: 0.0.40
codegen_flags: <defaults>
</compile_context>

<pallas_src>
import jax
import jax.numpy as jnp
from jax.experimental import pallas as pl
from jax.experimental.pallas import tpu as pltpu

POOL_KH, POOL_KW = 66, 56
K_WIN = POOL_KH * POOL_KW            # 3696 elements per pooling window
INV_WIN = 1.0 / float(K_WIN)


def _avgpool_add_kernel(x_ref, sel_ref, other_ref, o_ref):
    # x_ref:     (POOL_KH, W_crop)  one band of pooling rows, native layout
    # sel_ref:   (W_crop, w_out)    lane-group selector * 1/K_WIN (resident)
    # other_ref: (1, w_out)         additive term
    # o_ref:     (1, w_out)         output row
    # VPU sublane reduction with f32 accumulation (no f32 copy of a bf16 tile).
    row_sum = jnp.sum(x_ref[...], axis=0, keepdims=True, dtype=jnp.float32)
    # Collapse each 56-lane group and apply the 1/3696 scale in one tiny matmul.
    pooled = jnp.dot(row_sum, sel_ref[...], preferred_element_type=jnp.float32)
    o_ref[...] = (pooled + other_ref[...].astype(jnp.float32)).astype(o_ref.dtype)


def model_forward(x1, other=True, *, key=None):
    """Equivalent of Model.forward(x1, other=True)."""
    n, c, h, w = x1.shape
    h_out, w_out = h // POOL_KH, w // POOL_KW
    assert h_out >= 1 and w_out >= 1, "input smaller than pooling kernel"
    v1_shape = (n, c, h_out, w_out)

    if other is True:
        if key is None:
            key = jax.random.PRNGKey(0)
        # TODO(synk): torch.randn uses torch's RNG stream; values differ from JAX PRNG.
        other_arr = jax.random.normal(key, v1_shape, dtype=x1.dtype)
    else:
        other_arr = jnp.broadcast_to(jnp.asarray(other, dtype=x1.dtype), v1_shape)

    h_crop, w_crop = h_out * POOL_KH, w_out * POOL_KW
    g = n * c * h_out

    # Native-layout pooling input.  Exact-multiple dims -> pure reshape (free,
    # zero-copy).  Otherwise a single crop copy (PyTorch drops the remainder).
    xv = x1 if (h_crop, w_crop) == (h, w) else x1[:, :, :h_crop, :w_crop]
    xw = xv.reshape(g, POOL_KH, w_crop)

    other_rows = other_arr.reshape(g, 1, w_out)

    # Selection matrix: sel[j, k] = 1/K_WIN if column j belongs to window k.
    col_group = jnp.arange(w_crop, dtype=jnp.int32) // POOL_KW
    sel = (col_group[:, None] == jnp.arange(w_out, dtype=jnp.int32)[None, :])
    sel = sel.astype(jnp.float32) * jnp.float32(INV_WIN)

    out = pl.pallas_call(
        _avgpool_add_kernel,
        out_shape=jax.ShapeDtypeStruct((g, 1, w_out), x1.dtype),
        grid=(g,),
        in_specs=[
            # one full (POOL_KH, W_crop) band per grid step — trailing dims are
            # full-extent, so no (8,128) padding / transpose is needed.
            pl.BlockSpec((pl.Squeezed(), POOL_KH, w_crop), lambda i: (i, 0, 0)),
            # selection matrix: same block every step -> loaded once, resident.
            pl.BlockSpec((w_crop, w_out), lambda i: (0, 0)),
            pl.BlockSpec((pl.Squeezed(), 1, w_out), lambda i: (i, 0, 0)),
        ],
        out_specs=pl.BlockSpec((pl.Squeezed(), 1, w_out), lambda i: (i, 0, 0)),
        compiler_params=pltpu.CompilerParams(
            dimension_semantics=("parallel",),
            vmem_limit_bytes=32 * 1024 * 1024,
        ),
    )(xw, sel, other_rows)

    return out.reshape(v1_shape)


def _reference(x, other_arr):
    n, c, h, w = x.shape
    h_out, w_out = h // POOL_KH, w // POOL_KW
    xc = x[:, :, : h_out * POOL_KH, : w_out * POOL_KW]
    pooled = xc.reshape(n, c, h_out, POOL_KH, w_out, POOL_KW).mean(axis=(3, 5))
    return pooled + other_arr


if __name__ == "__main__":
    key = jax.random.PRNGKey(0)
    kx, kn, kx2, kn2 = jax.random.split(key, 4)

    # Case 1: spatial dims are exact multiples of the (66, 56) window
    # -> zero-copy reshape path.  Pooled shape (2, 3, 2, 2).
    x1 = jax.random.normal(kx, (2, 3, 132, 112), dtype=jnp.float32)
    out1 = jax.block_until_ready(model_forward(x1, other=True, key=kn))
    ref1 = _reference(x1, jax.random.normal(kn, (2, 3, 2, 2), dtype=x1.dtype))
    assert out1.shape == (2, 3, 2, 2)
    assert jnp.allclose(out1, ref1, atol=1e-5, rtol=1e-5)

    # Case 2: remainder rows/cols (PyTorch AvgPool2d drops partial windows)
    # -> single crop copy, same kernel.  Pooled shape (1, 4, 2, 2).
    x2 = jax.random.normal(kx2, (1, 4, 140, 120), dtype=jnp.float32)
    out2 = jax.block_until_ready(model_forward(x2, other=True, key=kn2))
    ref2 = _reference(x2, jax.random.normal(kn2, (1, 4, 2, 2), dtype=x2.dtype))
    assert out2.shape == (1, 4, 2, 2)
    assert jnp.allclose(out2, ref2, atol=1e-5, rtol=1e-5)

    print("KERNEL_OK")
</pallas_src>

<mosaic_0001>
module attributes {stable_mosaic.version = 11 : i64} {
  func.func @_avgpool_add_kernel(%arg0: i32, %arg1: memref<1x66x112xf32, #tpu.memory_space<vmem>>, %arg2: memref<112x2xf32, #tpu.memory_space<vmem>>, %arg3: memref<1x1x2xf32, #tpu.memory_space<vmem>>, %arg4: memref<1x1x2xf32, #tpu.memory_space<vmem>>) attributes {dimension_semantics = [#tpu.dimension_semantics<parallel>], iteration_bounds = array<i64: 12>, scalar_prefetch = 0 : i64, scratch_operands = 0 : i64, tpu.core_type = #tpu.core_type<tc>, window_params = [{transform_indices = @transform_0, window_bounds = array<i64: 1, 66, 112>}, {pipeline_mode = #tpu.pipeline_mode<synchronous>, transform_indices = @transform_1, window_bounds = array<i64: 112, 2>}, {transform_indices = @transform_2, window_bounds = array<i64: 1, 1, 2>}, {transform_indices = @transform_3, window_bounds = array<i64: 1, 1, 2>}]} {
    %c0 = arith.constant 0 : index
    %c0_0 = arith.constant 0 : index
    %c0_1 = arith.constant 0 : index
    %0 = vector.load %arg1[%c0, %c0_0, %c0_1] : memref<1x66x112xf32, #tpu.memory_space<vmem>>, vector<1x66x112xf32>
    %1 = vector.shape_cast %0 : vector<1x66x112xf32> to vector<66x112xf32>
    %cst = arith.constant dense<0.000000e+00> : vector<112xf32>
    %2 = vector.multi_reduction <add>, %1, %cst [0] : vector<66x112xf32> to vector<112xf32>
    %3 = vector.shape_cast %2 : vector<112xf32> to vector<1x112xf32>
    %c0_2 = arith.constant 0 : index
    %c0_3 = arith.constant 0 : index
    %4 = vector.load %arg2[%c0_2, %c0_3] : memref<112x2xf32, #tpu.memory_space<vmem>>, vector<112x2xf32>
    %cst_4 = arith.constant dense<0.000000e+00> : vector<1x2xf32>
    %5 = tpu.matmul %3, %4, %cst_4 {dimension_numbers = #tpu.dot_dimension_numbers<[1], [0], [0], [1], [0, 0, 1, 1], [], []>} : vector<1x112xf32>, vector<112x2xf32>, vector<1x2xf32> -> vector<1x2xf32>
    %c0_5 = arith.constant 0 : index
    %c0_6 = arith.constant 0 : index
    %c0_7 = arith.constant 0 : index
    %6 = vector.load %arg3[%c0_5, %c0_6, %c0_7] : memref<1x1x2xf32, #tpu.memory_space<vmem>>, vector<1x1x2xf32>
    %7 = vector.shape_cast %6 : vector<1x1x2xf32> to vector<1x2xf32>
    %8 = arith.addf %5, %7 : vector<1x2xf32>
    %c0_8 = arith.constant 0 : index
    %c0_9 = arith.constant 0 : index
    %c0_10 = arith.constant 0 : index
    %9 = vector.load %arg4[%c0_8, %c0_9, %c0_10] : memref<1x1x2xf32, #tpu.memory_space<vmem>>, vector<1x1x2xf32>
    %10 = vector.shape_cast %9 : vector<1x1x2xf32> to vector<1x2xf32>
    %11 = vector.shape_cast %8 : vector<1x2xf32> to vector<1x1x2xf32>
    tpu.vector_store %arg4[%c0_8, %c0_9, %c0_10], %11 {strides = array<i32>} : memref<1x1x2xf32, #tpu.memory_space<vmem>>, vector<1x1x2xf32>,
    return
  }
  func.func @transform_0(%arg0: i32) -> (i32, i32, i32) {
    %c0_i32 = arith.constant 0 : i32
    %c0_i32_0 = arith.constant 0 : i32
    %c0_i32_1 = arith.constant 0 : i32
    return %arg0, %c0_i32, %c0_i32_0 : i32, i32, i32
  }
  func.func @transform_1(%arg0: i32) -> (i32, i32) {
    %c0_i32 = arith.constant 0 : i32
    %c0_i32_0 = arith.constant 0 : i32
    %c0_i32_1 = arith.constant 0 : i32
    return %c0_i32, %c0_i32_0 : i32, i32
  }
  func.func @transform_2(%arg0: i32) -> (i32, i32, i32) {
    %c0_i32 = arith.constant 0 : i32
    %c0_i32_0 = arith.constant 0 : i32
    %c0_i32_1 = arith.constant 0 : i32
    return %arg0, %c0_i32, %c0_i32_0 : i32, i32, i32
  }
  func.func @transform_3(%arg0: i32) -> (i32, i32, i32) {
    %c0_i32 = arith.constant 0 : i32
    %c0_i32_0 = arith.constant 0 : i32
    %c0_i32_1 = arith.constant 0 : i32
    return %arg0, %c0_i32, %c0_i32_0 : i32, i32, i32
  }
}

</mosaic_0001>

<bundles_post_ra>
// kernel: tpu_custom_call.1
= control target key start
LH: loop header
LB: loop body
LE: loop exit
PB: predicated region body
PF: predicated region fallthrough
CT: control target
= control target key end

     0   :  { %8 = vsyncpa [#allocation3], 0  ;;  %s763_s0 = inlined_call_operand.hbm [shape: f32[12,66,112], index: 0, kind: input, shape index: {}]   ;;  %s764_s1 = inlined_call_operand.vmem [shape: f32[112,2], index: 1, kind: input, shape index: {}]   ;;  %s765_s2 = inlined_call_operand.vmem [shape: f32[12,1,2], index: 2, kind: input, shape index: {}]   ;;  %s766_s3 = inlined_call_operand.vmem [shape: f32[12,1,2], index: 3, kind: output, shape index: {}]  }
   0x1   :  { %10 = vsyncpa [#allocation3 + $0x1], 0  ;;  %s582_s12 = smov 0   ;;  %s584_s13 = smov 0  }
   0x2   :  { %s586_s14 = smov 0   ;;  %s588_s15 = smov 0  }
   0x3 LB: > { %s601_s16 = sadd.s32 4294967295, %s555_s15   ;;  %s604_s17 = sadd.s32 1, %s555_s15   ;;  %s555_s15 = sphi %s588_s15, %s775_s15   ;;  %s551_s14 = sphi %s586_s14, %s774_s14   ;;  %s547_s13 = sphi %s584_s13, %s773_s13   ;;  %s543_s12 = sphi %s582_s12, %s772_s12  }
   0x4   : > { %s20_s18 = ssub.s32 %s555_s15, %s604_s17  ;;  %s23_s19 = sadd.s32 1, %s551_s14 }
   0x5   : > { %p21_p0 = scmp.eq.s32.totalorder %s20_s18, 0  ;;  %p30_p1 = scmp.ne.s32.totalorder %s551_s14, %s547_s13 }
   0x6   : > { %p31_p2 = scmp.eq.s32.totalorder %s555_s15, 0  ;;  %p36_p3 = scmp.ne.s32.totalorder %s547_s13, %s543_s12 }
   0x7   : > { %s614_s20 = scalar_select %p21_p0, %s551_s14, %s23_s19  }
   0x8   : > { %p32_p4 = por %p31_p2, %p30_p1  ;;  %p37_p5 = scmp.eq.s32.totalorder %s601_s16, 0 }
   0x9   : > { %p456_p6 = scmp.lt.s32.totalorder %s555_s15, 12  ;;  %s136_s22 = sand.u32 1, %s551_s14  }
   0xa   : > { %p618_p7 = por %p37_p5, %p36_p3  ;;  %s447_s23 = smul.u32 72, %s136_s22 }
   0xb   : > { %s448_s24 = smul.u32 1152, %s555_s15  ;;  %p624_p8 = pnand %p456_p6, %p32_p4 }
   0xc   : > { %s768_s21 = scalar_select %p618_p7, 1, 0 }
   0xd   : > { %s631_s28 = scalar_lea.hbm %s763_s0, %s448_s24  ;;  %s140_s29 = scalar_lea.vmem [#allocation2], %s447_s23 }
   0xe   : > { %s147_s30 = sshll.u32 %s140_s29, 4  ;;  %s636_s4 = scalar_lea.sflag [#allocation3], %s136_s22  ;;  %s633_s30 = int_to_ptr.vmem [resolvable:$true] %s147_s30 }
   0xf   : > { %s493_s5 = scalar_lea.hbm %s631_s28, 1152  ;;  %p495_p11 = pneg %p624_p8 }
  0x10   : > { %p494_p10 = scmp.ne.s32.totalorder %s631_s28, %s493_s5  ;;  %s498_s8 = scalar_lea.hbm %s763_s0, 13824 }
  0x11   : > { %p499_p0 = scmp.lt.s32.totalorder %s631_s28, %s763_s0  ;;  %p500_p1 = scmp.lt.s32.totalorder %s498_s8, %s493_s5 }
  0x12   : > { %p496_p12 = pnand %p495_p11, %p494_p10 }
  0x13   : > { %p501_p2 = por %p500_p1, %p499_p0 }
  0x14   : > { %p497_p13 = pneg %p496_p12 }
  0x16   : > { %p502_p3 = pnand %p501_p2, %p497_p13 }
  0x18   : > { %505 = shalt.err (!%p502_p3)
}
  0x19   : > { %s506_s11 = scalar_lea.vmem %s633_s30, 1152  ;;  %s557_s12 = smov [#allocation2]  }
  0x1a   : > { %p507_p4 = scmp.ne.s32.totalorder %s633_s30, %s506_s11  ;;  %s511_s18 = sshll.u32 %s557_s12, 4  ;;  %s512_s18 = int_to_ptr.vmem [resolvable:$false] %s511_s18 }
  0x1b   : > { %s513_s19 = scalar_lea.vmem %s512_s18, 2304  ;;  %p514_p10 = scmp.lt.s32.totalorder %s633_s30, %s512_s18 }
  0x1c   : > { %p509_p5 = pnand %p507_p4, %p495_p11  ;;  %p515_p12 = scmp.lt.s32.totalorder %s513_s19, %s506_s11 }
  0x1e   : > { %p510_p6 = pneg %p509_p5  ;;  %p516_p9 = por %p515_p12, %p514_p10 }
  0x20   : > { %p517_p7 = pnand %p516_p9, %p510_p6 }
  0x22   : > { %520 = shalt.err (!%p517_p7)
}
  0x23   : > { %s558_s22 = smov 128   ;;  %s559_s23 = smov 8  }
  0x24   : > { %455 = dma.hbm_to_vmem [thread:$0]  (!%p624_p8), %s631_s28, 1152, %s633_s30, %s636_s4, %s558_s22, %s558_s22, %s559_s23  }
  0x25   : > { %p161_p11 = scmp.lt.s32.totalorder %s555_s15, 13  ;;  %p770_p13 = scmp.ge.s32.totalorder %s555_s15, 1 }
  0x27   : > { %p162_p0 = pnand %p770_p13, %p161_p11 }
  0x28   : > { %s167_s24 = sand.u32 (!%p162_p0), 1, %s547_s13   ;;  %p771_p7 = scmp.ne.s32.totalorder (!%p162_p0), %s768_s21, 0 }
  0x29   : > { %165 = sbr.rel (%p162_p0) target bundleno = 275 (0x113), region = 32  ;;  %s168_s27 = scalar_lea.sflag (!%p162_p0), [#allocation3], %s167_s24 }
  0x2a   : > { %s449_s26 = smul.u32 (!%p162_p0), 72, %s167_s24 }
  0x2c   : > { %s661_s29 = scalar_lea.vmem (!%p162_p0), [#allocation2], %s449_s26 }
  0x2e   : > { %538 = dma.done.wait (%p771_p7), %s168_s27, 1152  }
  0x2f   : > { %540 = vsyncadd (%p771_p7), %s168_s27, 4294966144  ;;  %v560_v0 = vmov 0.0   ;;  %vm561_vm0 = vmmov 0   ;;  %v248_v1 = vld [vmem:[%s764_s1 + $0x68] sm:$0xff]  ;;  %v247_v2 = vld [vmem:[%s764_s1 + $0x60] sm:$0xff]  ;;  %vm210_vm1 = vcmask 916480  }
  0x30   : > { %416 = vmatprep.subr.mxu0 %v560_v0  ;;  %444 = vmatprep.mubr.msk.f32.mxu0 %vm561_vm0, %v560_v0  ;;  %v246_v3 = vld [vmem:[%s764_s1 + $0x58] sm:$0xff]  ;;  %v245_v4 = vld [vmem:[%s764_s1 + $0x50] sm:$0xff]  ;;  %v201_v5 = vld [vmem:[%s661_s29] sm:$0xff]  ;;  %vm226_vm2 = vcmask 910336   ;;  %p195_p8 = scmp.lt.s32.totalorder %s601_s16, 11  ;;  %vm323_vm3 = vcmask 8192  }
  0x31   : > { %417 = vmatpush3.msra.mxu0 %v248_v1  ;;  %v202_v6 = vld [vmem:[%s661_s29 + $0x8] sm:$0xff]  ;;  %v203_v7 = vld [vmem:[%s661_s29 + $0x10] sm:$0xff]  ;;  %v204_v8 = vld [vmem:[%s661_s29 + $0x18] sm:$0xff]  ;;  %v211_v9 = vsel %vm210_vm1, %v201_v5, 0.0 }
  0x32   : > { %418 = vmatprep.subr.mxu0 %v560_v0  ;;  %v244_v10 = vld [vmem:[%s764_s1 + $0x48] sm:$0xff]  ;;  %v212_v11 = vsel %vm210_vm1, %v202_v6, 0.0  ;;  %v214_v12 = vsel %vm210_vm1, %v203_v7, 0.0  ;;  %v243_v15 = vld [vmem:[%s764_s1 + $0x40] sm:$0xff]  ;;  %v216_v16 = vsel %vm210_vm1, %v204_v8, 0.0  ;;  %v242_v19 = vld [vmem:[%s764_s1 + $0x38] sm:$0xff] }
  0x33   : > { %419 = vmatpush3.msra.mxu0 %v247_v2  ;;  %v205_v13 = vld [vmem:[%s661_s29 + $0x20] sm:$0xff]  ;;  %v213_v14 = vadd.f32 %v212_v11, %v211_v9  ;;  %v206_v17 = vld [vmem:[%s661_s29 + $0x28] sm:$0xff]  ;;  %v207_v21 = vld [vmem:[%s661_s29 + $0x30] sm:$0xff]  ;;  %s777_s16 = smov (!%p195_p8, %s601_s16), 11 }
  0x34   : > { %420 = vmatprep.subr.mxu0 %v560_v0  ;;  %v218_v20 = vsel %vm210_vm1, %v205_v13, 0.0  ;;  %v241_v23 = vld [vmem:[%s764_s1 + $0x30] sm:$0xff]  ;;  %v220_v24 = vsel %vm210_vm1, %v206_v17, 0.0  ;;  %v208_v25 = vld [vmem:[%s661_s29 + $0x38] sm:$0xff]  ;;  %v240_v27 = vld [vmem:[%s764_s1 + $0x28] sm:$0xff]  ;;  %v222_v28 = vsel %vm210_vm1, %v207_v21, 0.0  ;;  %s197_s7 = scalar_lea.vmem %s765_s2, %s777_s16  ;;  %s200_s10 = scalar_lea.vmem %s766_s3, %s777_s16 }
  0x35   : > { %421 = vmatpush3.msra.mxu0 %v246_v3  ;;  %v215_v18 = vadd.f32 %v214_v12, %v213_v14  ;;  %v209_v29 = vld [vmem:[%s661_s29 + $0x40] sm:$0x3]  ;;  %v224_v32 = vsel %vm210_vm1, %v208_v25, 0.0  ;;  %v238_v34 = vld [vmem:[%s764_s1 + $0x18] sm:$0xff]  ;;  %v237_v37 = vld [vmem:[%s764_s1 + $0x10] sm:$0xff] }
  0x36   : > { %422 = vmatprep.subr.mxu0 %v560_v0  ;;  %v239_v31 = vld [vmem:[%s764_s1 + $0x20] sm:$0xff]  ;;  %v227_v35 = vsel %vm226_vm2, %v209_v29, 0.0  ;;  %v236_v39 = vld [vmem:[%s764_s1 + $0x8] sm:$0xff] }
  0x37   : > { %423 = vmatpush3.msra.mxu0 %v245_v4  ;;  %v217_v22 = vadd.f32 %v216_v16, %v215_v18  ;;  %v235_v41 = vld [vmem:[%s764_s1] sm:$0xff] }
  0x38   : > { %424 = vmatprep.subr.mxu0 %v560_v0  ;;  %v249_v47 = vld [vmem:[%s197_s7] sm:$0x1] }
  0x39   : > { %425 = vmatpush3.msra.mxu0 %v244_v10  ;;  %v219_v26 = vadd.f32 %v218_v20, %v217_v22 }
  0x3a   : > { %426 = vmatprep.subr.mxu0 %v560_v0 }
  0x3b   : > { %427 = vmatpush3.msra.mxu0 %v243_v15  ;;  %v221_v30 = vadd.f32 %v220_v24, %v219_v26 }
  0x3c   : > { %428 = vmatprep.subr.mxu0 %v560_v0 }
  0x3d   : > { %429 = vmatpush3.msra.mxu0 %v242_v19  ;;  %v223_v33 = vadd.f32 %v222_v28, %v221_v30 }
  0x3e   : > { %430 = vmatprep.subr.mxu0 %v560_v0 }
  0x3f   : > { %431 = vmatpush3.msra.mxu0 %v241_v23  ;;  %v225_v36 = vadd.f32 %v224_v32, %v223_v33 }
  0x40   : > { %432 = vmatprep.subr.mxu0 %v560_v0 }
  0x41   : > { %433 = vmatpush3.msra.mxu0 %v240_v27  ;;  %v228_v38 = vadd.f32 %v227_v35, %v225_v36 }
  0x42   : > { %434 = vmatprep.subr.mxu0 %v560_v0 }
  0x43   : > { %435 = vmatpush3.msra.mxu0 %v239_v31  ;;  %v229_v40 = vrot.slane %v228_v38, 4 }
  0x44   : > { %436 = vmatprep.subr.mxu0 %v560_v0 }
  0x45   : > { %437 = vmatpush3.msra.mxu0 %v238_v34  ;;  %v230_v42 = vadd.f32 %v229_v40, %v228_v38 }
  0x46   : > { %438 = vmatprep.subr.mxu0 %v560_v0 }
  0x47   : > { %439 = vmatpush3.msra.mxu0 %v237_v37  ;;  %v231_v43 = vrot.slane %v230_v42, 2 }
  0x48   : > { %440 = vmatprep.subr.mxu0 %v560_v0 }
  0x49   : > { %441 = vmatpush3.msra.mxu0 %v236_v39  ;;  %v232_v44 = vadd.f32 %v231_v43, %v230_v42 }
  0x4a   : > { %442 = vmatprep.subr.mxu0 %v560_v0 }
  0x4b   : > { %443 = vmatpush3.msra.mxu0 %v235_v41  ;;  %v233_v45 = vrot.slane %v232_v44, 1 }
  0x4d   : > { %v234_v46 = vadd.f32 %v233_v45, %v232_v44 }
  0x4f   : > { %445 = vmatmul.mubr.msk.f32.vlgmr.msra.gmra.mxu0 %vm210_vm1, %v234_v46 }
 0x10f   : > { %v319_v48 = vpop.f32.mrf.mxu0 }
 0x110   : > { %v320_v49 = vadd.f32 %v319_v48, %v249_v47 }
 0x111   : > { %v446_v50 = vpop.f32.mrf.mxu0 }
 0x112   : > { %324 = vst.msk [vmem:[%s200_s10] sm:$0x1] %vm323_vm3, %v320_v49 }
 0x113 PF: > { %p13_p9 = scmp.ge.s32.totalorder %s604_s17, 14   ;;  %s772_s12 = smov %s547_s13 }
 0x114   : > { %s773_s13 = smov %s551_s14  ;;  %s774_s14 = smov %s614_s20 }
 0x115   : > { %s775_s15 = smov %s604_s17  ;;  %15 = sbr.rel (!%p13_p9) target bundleno = 3 (0x3), region = 75 }
 0x11a   :  { %342 = vsyncpa [#allocation3], 1 }
 0x11b   :  { %344 = vsyncpa [#allocation3 + $0x1], 1 }

</bundles_post_ra>
